<compile_context>
chip_gen: v7x
topology: tpu7x:2x2x1
jax: 0.10.0
libtpu: 0.0.40
codegen_flags: <defaults>
</compile_context>

<pallas_src>
import functools

import jax
import jax.numpy as jnp
from jax.experimental import pallas as pl
from jax.experimental.pallas import tpu as pltpu

# ---------------- config (mirrors args.*) ----------------
N_AGENTS = 4
OBS_INPUT_DIMS = 32      # args.obs_input_dims (E)
STATE_DIMS = 8           # args.state_dims (S)
Z_DIMS = 16              # args.z_dims (Z)
VAR_FLOOR = 0.002        # args.var_floor
TWO_HYPER_LAYERS = False # args.two_hyper_layers -> single Linear hyper-net
BN_EPS = 1e-5
LEAKY_SLOPE = 0.01       # nn.LeakyReLU default


def _round_up(x, m):
    return ((x + m - 1) // m) * m


def _idiv(x, d):
    # integer divide of an i32 array by a Python int (shift for powers of two).
    if d & (d - 1) == 0:
        return x >> (d.bit_length() - 1)
    return x // d


def _imod(x, d):
    if d & (d - 1) == 0:
        return x & (d - 1)
    return x % d


def _elu(x):
    # F.elu (alpha=1). min() keeps the unselected exp branch from overflowing.
    return jnp.where(x > 0, x, jnp.exp(jnp.minimum(x, 0.0)) - 1.0)


def _leaky_relu(x):
    return jnp.where(x > 0, x, LEAKY_SLOPE * x)


# ---------------- kernel ----------------
def high_level_kernel(data_ref, params_ref, out_ref, h_ref, sum_ref, sq_ref, *,
                      obs_dims, state_dims, z_dims, var_floor, n_rows, block_n):
    e, s, z = obs_dims, state_dims, z_dims
    sz = s * z
    d_in = e + s
    # parameter slab row offsets (all matrix sections 8-row aligned)
    r_bh = d_in
    r_w1 = _round_up(d_in + 1, 8)
    r_w2 = r_w1 + 2 * z
    r_g = r_w2 + 2 * z

    phase = pl.program_id(0)
    blk = pl.program_id(1)
    row0 = pl.multiple_of(blk * block_n, 8)

    @pl.when(phase == 0)
    def _stats_pass():
        @pl.when(blk == 0)
        def _init():
            sum_ref[...] = jnp.zeros_like(sum_ref)
            sq_ref[...] = jnp.zeros_like(sq_ref)

        data = data_ref[...]                                 # (bn, E+S) = [obs || state]

        # fused hyper-network: one matmul -> [w1_flat || b1 || b1]
        # (state rows of the packed weight are zero, so the extra lanes are a no-op)
        w_h = params_ref[:d_in, :]                           # (E+S, S*Z + 2Z)
        b_h = params_ref[r_bh:r_bh + 1, :]                   # (1,   S*Z + 2Z)
        hy = jnp.dot(data, w_h, preferred_element_type=jnp.float32) + b_h
        hw = hy[:, :sz]                                      # (bn, S*Z)  per-row flattened w1
        b1_dup = hy[:, sz:sz + 2 * z]                        # (bn, 2Z)   [b1 || b1]

        # in-kernel state expansion: expand[r, c] = 1 iff r == E + c // Z
        r_io = jax.lax.broadcasted_iota(jnp.int32, (d_in, sz), 0)
        c_io = jax.lax.broadcasted_iota(jnp.int32, (d_in, sz), 1)
        expand = (r_io == e + _idiv(c_io, z)).astype(jnp.float32)
        state_exp = jnp.dot(data, expand, preferred_element_type=jnp.float32)  # (bn, S*Z)

        # batched vec-mat: zpre[n, c] = sum_s state[n, s] * w1[n, s, c % Z]
        # selector built from iota (previously a 16 KB constant DMA'd every call).
        rs = jax.lax.broadcasted_iota(jnp.int32, (sz, 2 * z), 0)
        cs = jax.lax.broadcasted_iota(jnp.int32, (sz, 2 * z), 1)
        sel = (_imod(rs, z) == _imod(cs, z)).astype(jnp.float32)                # (S*Z, 2Z)
        zpre = jnp.dot(state_exp * hw, sel, preferred_element_type=jnp.float32) + b1_dup
        z_hidden = _elu(zpre)                                # (bn, 2Z) = [zh || zh]

        # fused mu/sigma first Linear (block-diagonal). Linear biases dropped:
        # training-mode BatchNorm subtracts the batch mean so they cancel exactly.
        # TODO(synk): BatchNorm running_mean/running_var side-effect updates (and the
        # dropped bias' effect on them) are not reproduced.
        w1_bd = params_ref[r_w1:r_w1 + 2 * z, :2 * z]        # (2Z, 2Z) blkdiag(wm1, ws1)
        h = jnp.dot(z_hidden, w1_bd, preferred_element_type=jnp.float32)

        # masked one-pass batch statistics (padded rows excluded).
        gid = row0 + jax.lax.broadcasted_iota(jnp.int32, h.shape, 0)
        h_m = jnp.where(gid < n_rows, h, 0.0)
        sum_ref[...] += jnp.sum(h_m, axis=0, keepdims=True)
        sq_ref[...] += jnp.sum(h_m * h_m, axis=0, keepdims=True)

        # stage h for phase 1 (no recompute of the hyper-net in the second pass)
        h_ref[pl.ds(row0, block_n), :] = h

    @pl.when(phase == 1)
    def _norm_pass():
        w2_bd = params_ref[r_w2:r_w2 + 2 * z, :2 * z]        # (2Z, 2Z) blkdiag(wm2, ws2)
        gamma = params_ref[r_g:r_g + 1, :2 * z]              # [gamma_mu || gamma_sg]
        beta = params_ref[r_g + 1:r_g + 2, :2 * z]           # [beta_mu  || beta_sg]
        b2h = params_ref[r_g + 2:r_g + 3, :2 * z]            # [bm2 || bs2]

        h = h_ref[pl.ds(row0, block_n), :]
        inv_n = 1.0 / n_rows
        mean = sum_ref[...] * inv_n
        # TODO(synk): one-pass E[x^2]-E[x]^2 can cancel for |mean| >> std; clamped at 0.
        var = jnp.maximum(sq_ref[...] * inv_n - mean * mean, 0.0)
        hn = (h - mean) * jax.lax.rsqrt(var + BN_EPS) * gamma + beta
        hn = _leaky_relu(hn)
        out = jnp.dot(hn, w2_bd, preferred_element_type=jnp.float32) + b2h     # [mu || sg]

        # lanes [0, Z): mu ; lanes [Z, 2Z): std = sqrt(clamp(exp(sg), var_floor))
        lane = jax.lax.broadcasted_iota(jnp.int32, out.shape, 1)
        std_branch = jnp.sqrt(jnp.maximum(jnp.exp(out), var_floor))
        out_ref[...] = jnp.where(lane >= z, std_branch, out)


# ---------------- parameter init (PyTorch-style Linear init) ----------------
def init_params(key, e, s, z):
    def linear(k, fan_in, fan_out):
        kw, kb = jax.random.split(k)
        lim = 1.0 / jnp.sqrt(fan_in)
        w = jax.random.uniform(kw, (fan_in, fan_out), jnp.float32, -lim, lim)
        b = jax.random.uniform(kb, (1, fan_out), jnp.float32, -lim, lim)
        return w, b

    ks = jax.random.split(key, 6)
    p = {}
    p["w1_w"], p["w1_b"] = linear(ks[0], e, s * z)   # two_hyper_layers=False path
    p["b1_w"], p["b1_b"] = linear(ks[1], e, z)
    p["mu1_w"], p["mu1_b"] = linear(ks[2], z, z)
    p["mu2_w"], p["mu2_b"] = linear(ks[3], z, z)
    p["sg1_w"], p["sg1_b"] = linear(ks[4], z, z)
    p["sg2_w"], p["sg2_b"] = linear(ks[5], z, z)
    p["mu_bn_g"] = jnp.ones((1, z), jnp.float32)
    p["mu_bn_b"] = jnp.zeros((1, z), jnp.float32)
    p["sg_bn_g"] = jnp.ones((1, z), jnp.float32)
    p["sg_bn_b"] = jnp.zeros((1, z), jnp.float32)
    return p


def pack_params(p, e, s, z):
    """Pack all parameters into ONE f32 slab (single DMA, VMEM-resident over the grid)."""
    sz = s * z
    f32 = jnp.float32
    w = sz + 2 * z            # 160 lanes
    d_in = e + s              # 40 activation lanes: [obs || state]

    # fused hyper weights [w1_w || b1_w || b1_w], extended with zero rows for the
    # state lanes so hy = data @ w_full needs no lane slicing of the activations.
    w_cat = jnp.concatenate([p["w1_w"], p["b1_w"], p["b1_w"]], axis=1)       # (E, 160)
    w_full = jnp.concatenate([w_cat, jnp.zeros((s, w), f32)], axis=0)        # (E+S, 160)
    b_cat = jnp.concatenate([p["w1_b"], p["b1_b"], p["b1_b"]], axis=1)       # (1, 160)

    zz = jnp.zeros((z, z), f32)
    w1_bd = jnp.concatenate(
        [jnp.concatenate([p["mu1_w"], zz], axis=1),
         jnp.concatenate([zz, p["sg1_w"]], axis=1)], axis=0)                 # (2Z, 2Z)
    w2_bd = jnp.concatenate(
        [jnp.concatenate([p["mu2_w"], zz], axis=1),
         jnp.concatenate([zz, p["sg2_w"]], axis=1)], axis=0)                 # (2Z, 2Z)
    gamma = jnp.concatenate([p["mu_bn_g"], p["sg_bn_g"]], axis=1)
    beta = jnp.concatenate([p["mu_bn_b"], p["sg_bn_b"]], axis=1)
    b2h = jnp.concatenate([p["mu2_b"], p["sg2_b"]], axis=1)
    # NOTE: mu1_b / sg1_b are intentionally NOT packed: they cancel in training-mode BN.

    r_bh = d_in
    r_w1 = _round_up(d_in + 1, 8)
    r_w2 = r_w1 + 2 * z
    r_g = r_w2 + 2 * z
    rows = _round_up(r_g + 3, 8)

    slab = jnp.zeros((rows, w), f32)
    slab = slab.at[:d_in, :].set(w_full)
    slab = slab.at[r_bh:r_bh + 1, :].set(b_cat)
    slab = slab.at[r_w1:r_w1 + 2 * z, :2 * z].set(w1_bd)
    slab = slab.at[r_w2:r_w2 + 2 * z, :2 * z].set(w2_bd)
    slab = slab.at[r_g, :2 * z].set(gamma[0])
    slab = slab.at[r_g + 1, :2 * z].set(beta[0])
    slab = slab.at[r_g + 2, :2 * z].set(b2h[0])
    return slab


# ---------------- wrapper ----------------
def high_level_policy_forward(ep_batch_state, obs, t, param_slab, *, block_rows=512):
    """ep_batch_state: (b, T, S); obs: (b, a, E) -> (mu, std), each (b*a, Z)."""
    b, a, e = obs.shape
    s, z = STATE_DIMS, Z_DIMS
    n = b * a

    state = ep_batch_state[:, t, :]                                          # (b, S)
    state_rep = jnp.broadcast_to(state[:, None, :], (b, a, s)).reshape(n, s) # (N, S)
    obs_flat = obs.reshape(n, e)                                             # (N, E)
    data = jnp.concatenate([obs_flat, state_rep], axis=1)                    # (N, E+S) 40 lanes

    bn = min(_round_up(n, 8), _round_up(block_rows, 8))                      # row block (mult of 8)
    n_pad = _round_up(n, bn)
    if n_pad != n:
        data = jnp.concatenate(
            [data, jnp.zeros((n_pad - n, e + s), jnp.float32)], axis=0)
    nb = n_pad // bn

    kernel = functools.partial(
        high_level_kernel, obs_dims=e, state_dims=s, z_dims=z,
        var_floor=VAR_FLOOR, n_rows=n, block_n=bn)

    grid_spec = pltpu.PrefetchScalarGridSpec(
        num_scalar_prefetch=0,
        grid=(2, nb),                     # (phase, row block): 0 = stats, 1 = normalize
        in_specs=[
            # phase 0 walks the row blocks; phase 1 pins the last block (no re-DMA;
            # phase 1 only reads the staged h from scratch).
            pl.BlockSpec((bn, e + s), lambda p, i: ((1 - p) * i + p * (nb - 1), 0)),
            # single packed parameter slab, fetched once and resident over the grid.
            pl.BlockSpec(param_slab.shape, lambda p, i: (0, 0)),
        ],
        # output blocks are only produced (and written back) during phase 1.
        out_specs=pl.BlockSpec((bn, 2 * z), lambda p, i: (p * i, 0)),
        scratch_shapes=[
            pltpu.VMEM((n_pad, 2 * z), jnp.float32),   # staged h between phases
            pltpu.VMEM((1, 2 * z), jnp.float32),       # sum(h)
            pltpu.VMEM((1, 2 * z), jnp.float32),       # sum(h^2)
        ],
    )
    out = pl.pallas_call(
        kernel,
        grid_spec=grid_spec,
        out_shape=jax.ShapeDtypeStruct((n_pad, 2 * z), jnp.float32),
        compiler_params=pltpu.CompilerParams(
            dimension_semantics=("arbitrary", "arbitrary")),
    )(data, param_slab)
    return out[:n, :z], out[:n, z:]


# ---------------- pure-JAX reference (mirrors the torch forward) ----------------
def reference_forward(ep_batch_state, obs, t, p):
    b, a, e = obs.shape
    s, z = STATE_DIMS, Z_DIMS
    state = ep_batch_state[:, t, :]
    obs_f = obs.reshape(b * a, e)
    state_r = jnp.repeat(state[:, None, :], a, axis=1).reshape(b * a, 1, s)
    w1 = (obs_f @ p["w1_w"] + p["w1_b"]).reshape(-1, s, z)
    b1 = (obs_f @ p["b1_w"] + p["b1_b"]).reshape(-1, 1, z)
    zh = jnp.matmul(state_r, w1) + b1
    zh = jax.nn.elu(zh).reshape(b * a, z)

    def head(x, w1_, b1_, g, be, w2_, b2_):
        h = x @ w1_ + b1_
        m = jnp.mean(h, axis=0, keepdims=True)
        v = jnp.mean((h - m) ** 2, axis=0, keepdims=True)
        hn = (h - m) / jnp.sqrt(v + BN_EPS) * g + be
        hn = jnp.where(hn > 0, hn, LEAKY_SLOPE * hn)
        return hn @ w2_ + b2_

    mu = head(zh, p["mu1_w"], p["mu1_b"], p["mu_bn_g"], p["mu_bn_b"], p["mu2_w"], p["mu2_b"])
    sg = head(zh, p["sg1_w"], p["sg1_b"], p["sg_bn_g"], p["sg_bn_b"], p["sg2_w"], p["sg2_b"])
    var_c = jnp.maximum(jnp.exp(sg), VAR_FLOOR)
    return mu, jnp.sqrt(var_c)


if __name__ == "__main__":
    key = jax.random.PRNGKey(0)
    k_params, k_state, k_obs, k_state2, k_obs2 = jax.random.split(key, 5)

    b, a, T = 2, N_AGENTS, 5
    t = 2
    params = init_params(k_params, OBS_INPUT_DIMS, STATE_DIMS, Z_DIMS)
    param_slab = pack_params(params, OBS_INPUT_DIMS, STATE_DIMS, Z_DIMS)

    ep_batch_state = jax.random.normal(k_state, (b, T, STATE_DIMS), jnp.float32)
    obs = jax.random.normal(k_obs, (b, a, OBS_INPUT_DIMS), jnp.float32)

    mu, std = high_level_policy_forward(ep_batch_state, obs, t, param_slab)
    jax.block_until_ready((mu, std))

    mu_ref, std_ref = reference_forward(ep_batch_state, obs, t, params)
    assert mu.shape == (b * a, Z_DIMS) and std.shape == (b * a, Z_DIMS)
    assert bool(jnp.all(jnp.isfinite(mu))) and bool(jnp.all(std > 0))
    assert bool(jnp.allclose(mu, mu_ref, atol=1e-2, rtol=1e-2))
    assert bool(jnp.allclose(std, std_ref, atol=1e-2, rtol=1e-2))

    # exercise the multi-block + padded-rows grid path (nb > 1, masked BN stats)
    b2 = 5
    ep2 = jax.random.normal(k_state2, (b2, T, STATE_DIMS), jnp.float32)
    obs2 = jax.random.normal(k_obs2, (b2, N_AGENTS, OBS_INPUT_DIMS), jnp.float32)
    mu2, std2 = high_level_policy_forward(ep2, obs2, t, param_slab, block_rows=8)
    jax.block_until_ready((mu2, std2))
    mu2_ref, std2_ref = reference_forward(ep2, obs2, t, params)
    assert bool(jnp.allclose(mu2, mu2_ref, atol=1e-2, rtol=1e-2))
    assert bool(jnp.allclose(std2, std2_ref, atol=1e-2, rtol=1e-2))

    # TODO(synk): dist.rsample() (z_i) is computed but unused in the torch forward,
    # and BatchNorm running-stat updates are a training-mode side effect; both omitted.
    print("KERNEL_OK")
</pallas_src>

<mosaic_0001>
module attributes {stable_mosaic.version = 11 : i64} {
  func.func @high_level_kernel(%arg0: i32, %arg1: i32, %arg2: memref<8x40xf32, #tpu.memory_space<vmem>>, %arg3: memref<120x160xf32, #tpu.memory_space<vmem>>, %arg4: memref<8x32xf32, #tpu.memory_space<vmem>>, %arg5: memref<8x32xf32, #tpu.memory_space<vmem>>, %arg6: memref<1x32xf32, #tpu.memory_space<vmem>>, %arg7: memref<1x32xf32, #tpu.memory_space<vmem>>) attributes {dimension_semantics = [#tpu.dimension_semantics<arbitrary>, #tpu.dimension_semantics<arbitrary>], iteration_bounds = array<i64: 2, 1>, scalar_prefetch = 0 : i64, scratch_operands = 3 : i64, tpu.core_type = #tpu.core_type<tc>, window_params = [{transform_indices = @transform_0, window_bounds = array<i64: 8, 40>}, {pipeline_mode = #tpu.pipeline_mode<synchronous>, transform_indices = @transform_1, window_bounds = array<i64: 120, 160>}, {transform_indices = @transform_2, window_bounds = array<i64: 8, 32>}]} {
    %c8_i32 = arith.constant 8 : i32
    %0 = arith.muli %arg1, %c8_i32 : i32
    %1 = tpu.assume_multiple %0, 8 : i32
    %c0_i32 = arith.constant 0 : i32
    %2 = arith.cmpi eq, %arg0, %c0_i32 : i32
    %3 = arith.extui %2 : i1 to i32
    %c0_i32_0 = arith.constant 0 : i32
    %4 = arith.cmpi ne, %3, %c0_i32_0 : i32
    scf.if %4 {
      %c0_i32_2 = arith.constant 0 : i32
      %8 = arith.cmpi eq, %arg1, %c0_i32_2 : i32
      %9 = arith.extui %8 : i1 to i32
      %c0_i32_3 = arith.constant 0 : i32
      %10 = arith.cmpi ne, %9, %c0_i32_3 : i32
      scf.if %10 {
        %cst_29 = arith.constant 0.000000e+00 : f32
        %71 = vector.broadcast %cst_29 : f32 to vector<1x32xf32>
        %c0_30 = arith.constant 0 : index
        %c0_31 = arith.constant 0 : index
        %72 = vector.load %arg6[%c0_30, %c0_31] : memref<1x32xf32, #tpu.memory_space<vmem>>, vector<1x32xf32>
        tpu.vector_store %arg6[%c0_30, %c0_31], %71 {strides = array<i32>} : memref<1x32xf32, #tpu.memory_space<vmem>>, vector<1x32xf32>,
        %cst_32 = arith.constant 0.000000e+00 : f32
        %73 = vector.broadcast %cst_32 : f32 to vector<1x32xf32>
        %c0_33 = arith.constant 0 : index
        %c0_34 = arith.constant 0 : index
        %74 = vector.load %arg7[%c0_33, %c0_34] : memref<1x32xf32, #tpu.memory_space<vmem>>, vector<1x32xf32>
        tpu.vector_store %arg7[%c0_33, %c0_34], %73 {strides = array<i32>} : memref<1x32xf32, #tpu.memory_space<vmem>>, vector<1x32xf32>,
      } else {
      }
      %c0 = arith.constant 0 : index
      %c0_4 = arith.constant 0 : index
      %11 = vector.load %arg2[%c0, %c0_4] : memref<8x40xf32, #tpu.memory_space<vmem>>, vector<8x40xf32>
      %c0_5 = arith.constant 0 : index
      %c0_6 = arith.constant 0 : index
      %12 = vector.load %arg3[%c0_5, %c0_6] : memref<120x160xf32, #tpu.memory_space<vmem>>, vector<40x160xf32>
      %c40 = arith.constant 40 : index
      %c0_7 = arith.constant 0 : index
      %13 = vector.load %arg3[%c40, %c0_7] : memref<120x160xf32, #tpu.memory_space<vmem>>, vector<1x160xf32>
      %cst = arith.constant dense<0.000000e+00> : vector<8x160xf32>
      %14 = tpu.matmul %11, %12, %cst {dimension_numbers = #tpu.dot_dimension_numbers<[1], [0], [0], [1], [0, 0, 1, 1], [], []>} : vector<8x40xf32>, vector<40x160xf32>, vector<8x160xf32> -> vector<8x160xf32>
      %15 = vector.broadcast %13 : vector<1x160xf32> to vector<8x160xf32>
      %16 = arith.addf %14, %15 : vector<8x160xf32>
      %17 = vector.extract_strided_slice %16 {offsets = [0, 0], sizes = [8, 128], strides = [1, 1]} : vector<8x160xf32> to vector<8x128xf32>
      %18 = vector.extract_strided_slice %16 {offsets = [0, 128], sizes = [8, 32], strides = [1, 1]} : vector<8x160xf32> to vector<8x32xf32>
      %19 = tpu.iota {dimensions = array<i32: 0>} : vector<40x128xi32>
      %20 = tpu.iota {dimensions = array<i32: 1>} : vector<40x128xi32>
      %c4_i32 = arith.constant 4 : i32
      %21 = vector.broadcast %c4_i32 : i32 to vector<40x128xi32>
      %22 = arith.shrsi %20, %21 : vector<40x128xi32>
      %c32_i32 = arith.constant 32 : i32
      %23 = vector.broadcast %c32_i32 : i32 to vector<40x128xi32>
      %24 = arith.addi %23, %22 : vector<40x128xi32>
      %25 = arith.cmpi eq, %19, %24 : vector<40x128xi32>
      %26 = arith.extui %25 : vector<40x128xi1> to vector<40x128xi32>
      %27 = arith.sitofp %26 : vector<40x128xi32> to vector<40x128xf32>
      %cst_8 = arith.constant dense<0.000000e+00> : vector<8x128xf32>
      %28 = tpu.matmul %11, %27, %cst_8 {dimension_numbers = #tpu.dot_dimension_numbers<[1], [0], [0], [1], [0, 0, 1, 1], [], []>} : vector<8x40xf32>, vector<40x128xf32>, vector<8x128xf32> -> vector<8x128xf32>
      %29 = tpu.iota {dimensions = array<i32: 0>} : vector<128x32xi32>
      %30 = tpu.iota {dimensions = array<i32: 1>} : vector<128x32xi32>
      %c15_i32 = arith.constant 15 : i32
      %31 = vector.broadcast %c15_i32 : i32 to vector<128x32xi32>
      %32 = arith.andi %29, %31 : vector<128x32xi32>
      %c15_i32_9 = arith.constant 15 : i32
      %33 = vector.broadcast %c15_i32_9 : i32 to vector<128x32xi32>
      %34 = arith.andi %30, %33 : vector<128x32xi32>
      %35 = arith.cmpi eq, %32, %34 : vector<128x32xi32>
      %36 = arith.extui %35 : vector<128x32xi1> to vector<128x32xi32>
      %37 = arith.sitofp %36 : vector<128x32xi32> to vector<128x32xf32>
      %38 = arith.mulf %28, %17 : vector<8x128xf32>
      %cst_10 = arith.constant dense<0.000000e+00> : vector<8x32xf32>
      %39 = tpu.matmul %38, %37, %cst_10 {dimension_numbers = #tpu.dot_dimension_numbers<[1], [0], [0], [1], [0, 0, 1, 1], [], []>} : vector<8x128xf32>, vector<128x32xf32>, vector<8x32xf32> -> vector<8x32xf32>
      %40 = arith.addf %39, %18 : vector<8x32xf32>
      %cst_11 = arith.constant 0.000000e+00 : f32
      %41 = vector.broadcast %cst_11 : f32 to vector<8x32xf32>
      %42 = arith.cmpf ogt, %40, %41 : vector<8x32xf32>
      %cst_12 = arith.constant 0.000000e+00 : f32
      %43 = vector.broadcast %cst_12 : f32 to vector<8x32xf32>
      %44 = arith.minimumf %40, %43 : vector<8x32xf32>
      %45 = math.exp %44 : vector<8x32xf32>
      %cst_13 = arith.constant 1.000000e+00 : f32
      %46 = vector.broadcast %cst_13 : f32 to vector<8x32xf32>
      %47 = arith.subf %45, %46 : vector<8x32xf32>
      %48 = arith.select %42, %40, %47 : vector<8x32xi1>, vector<8x32xf32>
      %c48 = arith.constant 48 : index
      %c0_14 = arith.constant 0 : index
      %49 = vector.load %arg3[%c48, %c0_14] : memref<120x160xf32, #tpu.memory_space<vmem>>, vector<32x32xf32>
      %cst_15 = arith.constant dense<0.000000e+00> : vector<8x32xf32>
      %50 = tpu.matmul %48, %49, %cst_15 {dimension_numbers = #tpu.dot_dimension_numbers<[1], [0], [0], [1], [0, 0, 1, 1], [], []>} : vector<8x32xf32>, vector<32x32xf32>, vector<8x32xf32> -> vector<8x32xf32>
      %51 = tpu.iota {dimensions = array<i32: 0>} : vector<8x32xi32>
      %52 = vector.broadcast %1 : i32 to vector<8x32xi32>
      %53 = arith.addi %52, %51 : vector<8x32xi32>
      %c8_i32_16 = arith.constant 8 : i32
      %54 = vector.broadcast %c8_i32_16 : i32 to vector<8x32xi32>
      %55 = arith.cmpi slt, %53, %54 : vector<8x32xi32>
      %cst_17 = arith.constant 0.000000e+00 : f32
      %56 = vector.broadcast %cst_17 : f32 to vector<8x32xf32>
      %57 = arith.select %55, %50, %56 : vector<8x32xi1>, vector<8x32xf32>
      %c0_18 = arith.constant 0 : index
      %c0_19 = arith.constant 0 : index
      %58 = vector.load %arg6[%c0_18, %c0_19] : memref<1x32xf32, #tpu.memory_space<vmem>>, vector<1x32xf32>
      %cst_20 = arith.constant dense<0.000000e+00> : vector<32xf32>
      %59 = vector.multi_reduction <add>, %57, %cst_20 [0] : vector<8x32xf32> to vector<32xf32>
      %60 = vector.shape_cast %59 : vector<32xf32> to vector<1x32xf32>
      %61 = arith.addf %58, %60 : vector<1x32xf32>
      %c0_21 = arith.constant 0 : index
      %c0_22 = arith.constant 0 : index
      %62 = vector.load %arg6[%c0_21, %c0_22] : memref<1x32xf32, #tpu.memory_space<vmem>>, vector<1x32xf32>
      tpu.vector_store %arg6[%c0_21, %c0_22], %61 {strides = array<i32>} : memref<1x32xf32, #tpu.memory_space<vmem>>, vector<1x32xf32>,
      %c0_23 = arith.constant 0 : index
      %c0_24 = arith.constant 0 : index
      %63 = vector.load %arg7[%c0_23, %c0_24] : memref<1x32xf32, #tpu.memory_space<vmem>>, vector<1x32xf32>
      %64 = arith.mulf %57, %57 : vector<8x32xf32>
      %cst_25 = arith.constant dense<0.000000e+00> : vector<32xf32>
      %65 = vector.multi_reduction <add>, %64, %cst_25 [0] : vector<8x32xf32> to vector<32xf32>
      %66 = vector.shape_cast %65 : vector<32xf32> to vector<1x32xf32>
      %67 = arith.addf %63, %66 : vector<1x32xf32>
      %c0_26 = arith.constant 0 : index
      %c0_27 = arith.constant 0 : index
      %68 = vector.load %arg7[%c0_26, %c0_27] : memref<1x32xf32, #tpu.memory_space<vmem>>, vector<1x32xf32>
      tpu.vector_store %arg7[%c0_26, %c0_27], %67 {strides = array<i32>} : memref<1x32xf32, #tpu.memory_space<vmem>>, vector<1x32xf32>,
      %69 = arith.index_cast %1 : i32 to index
      %c0_28 = arith.constant 0 : index
      %70 = vector.load %arg5[%69, %c0_28] : memref<8x32xf32, #tpu.memory_space<vmem>>, vector<8x32xf32>
      tpu.vector_store %arg5[%69, %c0_28], %50 {strides = array<i32>} : memref<8x32xf32, #tpu.memory_space<vmem>>, vector<8x32xf32>,
    } else {
    }
    %c1_i32 = arith.constant 1 : i32
    %5 = arith.cmpi eq, %arg0, %c1_i32 : i32
    %6 = arith.extui %5 : i1 to i32
    %c0_i32_1 = arith.constant 0 : i32
    %7 = arith.cmpi ne, %6, %c0_i32_1 : i32
    scf.if %7 {
      %c80 = arith.constant 80 : index
      %c0 = arith.constant 0 : index
      %8 = vector.load %arg3[%c80, %c0] : memref<120x160xf32, #tpu.memory_space<vmem>>, vector<32x32xf32>
      %c112 = arith.constant 112 : index
      %c0_2 = arith.constant 0 : index
      %9 = vector.load %arg3[%c112, %c0_2] : memref<120x160xf32, #tpu.memory_space<vmem>>, vector<1x32xf32>
      %c113 = arith.constant 113 : index
      %c0_3 = arith.constant 0 : index
      %10 = vector.load %arg3[%c113, %c0_3] : memref<120x160xf32, #tpu.memory_space<vmem>>, vector<1x32xf32>
      %c114 = arith.constant 114 : index
      %c0_4 = arith.constant 0 : index
      %11 = vector.load %arg3[%c114, %c0_4] : memref<120x160xf32, #tpu.memory_space<vmem>>, vector<1x32xf32>
      %12 = arith.index_cast %1 : i32 to index
      %c0_5 = arith.constant 0 : index
      %13 = vector.load %arg5[%12, %c0_5] : memref<8x32xf32, #tpu.memory_space<vmem>>, vector<8x32xf32>
      %c0_6 = arith.constant 0 : index
      %c0_7 = arith.constant 0 : index
      %14 = vector.load %arg6[%c0_6, %c0_7] : memref<1x32xf32, #tpu.memory_space<vmem>>, vector<1x32xf32>
      %cst = arith.constant 1.250000e-01 : f32
      %15 = vector.broadcast %cst : f32 to vector<1x32xf32>
      %16 = arith.mulf %14, %15 : vector<1x32xf32>
      %c0_8 = arith.constant 0 : index
      %c0_9 = arith.constant 0 : index
      %17 = vector.load %arg7[%c0_8, %c0_9] : memref<1x32xf32, #tpu.memory_space<vmem>>, vector<1x32xf32>
      %cst_10 = arith.constant 1.250000e-01 : f32
      %18 = vector.broadcast %cst_10 : f32 to vector<1x32xf32>
      %19 = arith.mulf %17, %18 : vector<1x32xf32>
      %20 = arith.mulf %16, %16 : vector<1x32xf32>
      %21 = arith.subf %19, %20 : vector<1x32xf32>
      %cst_11 = arith.constant 0.000000e+00 : f32
      %22 = vector.broadcast %cst_11 : f32 to vector<1x32xf32>
      %23 = arith.maximumf %21, %22 : vector<1x32xf32>
      %24 = vector.broadcast %16 : vector<1x32xf32> to vector<8x32xf32>
      %25 = arith.subf %13, %24 : vector<8x32xf32>
      %cst_12 = arith.constant 9.99999974E-6 : f32
      %26 = vector.broadcast %cst_12 : f32 to vector<1x32xf32>
      %27 = arith.addf %23, %26 : vector<1x32xf32>
      %28 = math.rsqrt %27 : vector<1x32xf32>
      %29 = vector.broadcast %28 : vector<1x32xf32> to vector<8x32xf32>
      %30 = arith.mulf %25, %29 : vector<8x32xf32>
      %31 = vector.broadcast %9 : vector<1x32xf32> to vector<8x32xf32>
      %32 = arith.mulf %30, %31 : vector<8x32xf32>
      %33 = vector.broadcast %10 : vector<1x32xf32> to vector<8x32xf32>
      %34 = arith.addf %32, %33 : vector<8x32xf32>
      %cst_13 = arith.constant 0.000000e+00 : f32
      %35 = vector.broadcast %cst_13 : f32 to vector<8x32xf32>
      %36 = arith.cmpf ogt, %34, %35 : vector<8x32xf32>
      %cst_14 = arith.constant 0.00999999977 : f32
      %37 = vector.broadcast %cst_14 : f32 to vector<8x32xf32>
      %38 = arith.mulf %37, %34 : vector<8x32xf32>
      %39 = arith.select %36, %34, %38 : vector<8x32xi1>, vector<8x32xf32>
      %cst_15 = arith.constant dense<0.000000e+00> : vector<8x32xf32>
      %40 = tpu.matmul %39, %8, %cst_15 {dimension_numbers = #tpu.dot_dimension_numbers<[1], [0], [0], [1], [0, 0, 1, 1], [], []>} : vector<8x32xf32>, vector<32x32xf32>, vector<8x32xf32> -> vector<8x32xf32>
      %41 = vector.broadcast %11 : vector<1x32xf32> to vector<8x32xf32>
      %42 = arith.addf %40, %41 : vector<8x32xf32>
      %43 = tpu.iota {dimensions = array<i32: 1>} : vector<8x32xi32>
      %44 = math.exp %42 : vector<8x32xf32>
      %cst_16 = arith.constant 2.000000e-03 : f32
      %45 = vector.broadcast %cst_16 : f32 to vector<8x32xf32>
      %46 = arith.maximumf %44, %45 : vector<8x32xf32>
      %47 = math.sqrt %46 : vector<8x32xf32>
      %c16_i32 = arith.constant 16 : i32
      %48 = vector.broadcast %c16_i32 : i32 to vector<8x32xi32>
      %49 = arith.cmpi sge, %43, %48 : vector<8x32xi32>
      %50 = arith.select %49, %47, %42 : vector<8x32xi1>, vector<8x32xf32>
      %c0_17 = arith.constant 0 : index
      %c0_18 = arith.constant 0 : index
      %51 = vector.load %arg4[%c0_17, %c0_18] : memref<8x32xf32, #tpu.memory_space<vmem>>, vector<8x32xf32>
      tpu.vector_store %arg4[%c0_17, %c0_18], %50 {strides = array<i32>} : memref<8x32xf32, #tpu.memory_space<vmem>>, vector<8x32xf32>,
    } else {
    }
    return
  }
  func.func @transform_0(%arg0: i32, %arg1: i32) -> (i32, i32) {
    %c1_i32 = arith.constant 1 : i32
    %0 = arith.subi %c1_i32, %arg0 : i32
    %1 = arith.muli %0, %arg1 : i32
    %c0_i32 = arith.constant 0 : i32
    %2 = arith.muli %arg0, %c0_i32 : i32
    %3 = arith.addi %1, %2 : i32
    %c0_i32_0 = arith.constant 0 : i32
    %c0_i32_1 = arith.constant 0 : i32
    return %3, %c0_i32_0 : i32, i32
  }
  func.func @transform_1(%arg0: i32, %arg1: i32) -> (i32, i32) {
    %c0_i32 = arith.constant 0 : i32
    %c0_i32_0 = arith.constant 0 : i32
    %c0_i32_1 = arith.constant 0 : i32
    return %c0_i32, %c0_i32_0 : i32, i32
  }
  func.func @transform_2(%arg0: i32, %arg1: i32) -> (i32, i32) {
    %0 = arith.muli %arg0, %arg1 : i32
    %c0_i32 = arith.constant 0 : i32
    %c0_i32_0 = arith.constant 0 : i32
    return %0, %c0_i32 : i32, i32
  }
}

</mosaic_0001>

<bundles_post_ra>
// kernel: tpu_custom_call.1
= control target key start
LH: loop header
LB: loop body
LE: loop exit
PB: predicated region body
PF: predicated region fallthrough
CT: control target
= control target key end

     0   :  { %7 = vsyncpa [#allocation6], 0  ;;  %s1444_s0 = inlined_call_operand.vmem [shape: f32[8,40], index: 0, kind: input, shape index: {}]   ;;  %s1445_s1 = inlined_call_operand.vmem [shape: f32[120,160], index: 1, kind: input, shape index: {}]   ;;  %s1446_s2 = inlined_call_operand.hbm [shape: f32[8,32], index: 2, kind: output, shape index: {}]  }
   0x1   :  { %9 = vsyncpa [#allocation6 + $0x1], 0  ;;  %s1192_s9 = smov 0   ;;  %s1194_s10 = smov 0  }
   0x2   :  { %s1196_s11 = smov 0  }
   0x3 LB: > { %s849_s12 = sadd.s32 4294967295, %s1166_s11   ;;  %s850_s13 = sadd.s32 4294967294, %s1166_s11   ;;  %s1166_s11 = sphi %s1196_s11, %s15_s11   ;;  %s1162_s10 = sphi %s1194_s10, %s1463_s10   ;;  %s1158_s9 = sphi %s1192_s9, %s1462_s9  }
   0x4   : > { %s27_s14 = sadd.s32 1, %s1162_s10  ;;  %p854_p0 = scmp.ge.s32.totalorder %s1166_s11, 1 }
   0x5   : > { %p29_p1 = scmp.ge.s32.totalorder %s27_s14, 2  ;;  %p136_p2 = scmp.lt.s32.totalorder %s1166_s11, 3 }
   0x7   : > { %s1465_s14 = smov (%p29_p1, %s27_s14), 0  ;;  %p137_p3 = pnand %p854_p0, %p136_p2 }
   0x8   : > { %p855_p4 = scmp.ne.s32.totalorder (!%p137_p3), %s1158_s9, 0 }
   0x9   : > { %140 = sbr.rel (%p137_p3) target bundleno = 1021 (0x3fd), region = 28 }
  0x10   : > { %172 = sbr.rel (%p855_p4) target bundleno = 715 (0x2cb), region = 32  ;;  %v182_v0 = vld [vmem:[%s1445_s1 + $0x8] sm:$0xff] (!%p855_p4)  ;;  %v184_v1 = vld [vmem:[%s1445_s1 + $0x18] sm:$0xff] (!%p855_p4)  ;;  %v181_v2 = vld [vmem:[%s1445_s1] sm:$0xff] (!%p855_p4)  ;;  %v194_v3 = vlaneseq (!%p855_p4)  ;;  %v1168_v8 = vmov (!%p855_p4), 0.0   ;;  %v1169_v9 = vmov (!%p855_p4), 0.0|0.0  }
  0x11   : > { %v1012_v4 = vpack.c.bf16 (!%p855_p4), %v184_v1, %v182_v0  ;;  %v183_v5 = vld [vmem:[%s1445_s1 + $0x10] sm:$0xff] (!%p855_p4)  ;;  %v186_v6 = vld [vmem:[%s1445_s1 + $0x28] sm:$0xff] (!%p855_p4)  ;;  %v188_v7 = vld [vmem:[%s1445_s1 + $0x38] sm:$0xff] (!%p855_p4)  ;;  %272 = vmatprep.mubr.f32.mxu1 (!%p855_p4), %v1168_v8  ;;  %1026 = vmatprep.subr.bf16.mxu0 (!%p855_p4), %v1169_v9  ;;  %vm1170_vm0 = vmmov (!%p855_p4), 0   ;;  %vm204_vm4 = vcmask (!%p855_p4), 326656   ;;  %v1172_v50 = vmov (!%p855_p4), 1.0  }
  0x12   : > { %v1014_v10 = vpack.c.bf16 (!%p855_p4), %v183_v5, %v181_v2  ;;  %v1016_v11 = vpack.c.bf16 (!%p855_p4), %v188_v7, %v186_v6  ;;  %v185_v12 = vld [vmem:[%s1445_s1 + $0x20] sm:$0xff] (!%p855_p4)  ;;  %v187_v13 = vld [vmem:[%s1445_s1 + $0x30] sm:$0xff] (!%p855_p4)  ;;  %v1241_v14 = vshrl.u32 (!%p855_p4), %v194_v3, 7  ;;  %v286_v15 = vand.u32 (!%p855_p4), 127, %v194_v3  ;;  %987 = vmatprep.mubr.msk.f32.mxu0 (!%p855_p4), %vm1170_vm0, %v1168_v8  ;;  %v190_v24 = vld [vmem:[%s1445_s1 + $0x48] sm:$0xff] (!%p855_p4) }
  0x13   : > { %1013 = vmatprep.subr.bf16.mxu1 (!%p855_p4), %v1012_v4  ;;  %v1018_v16 = vpack.c.bf16 (!%p855_p4), %v187_v13, %v185_v12  ;;  %v189_v31 = vld [vmem:[%s1445_s1 + $0x40] sm:$0xff] (!%p855_p4)  ;;  %v1171_v40 = vmov (!%p855_p4), 1.0|1.0   ;;  %v856_v2 = vld [vmem:[%s1445_s1 + $0x50] ss:$8 sm:$0x3] (!%p855_p4) }
  0x14   : > { %1015 = vmatpush1.bf16.msra.mxu1 (!%p855_p4), %v1014_v10  ;;  %v281_v17 = vadd.s32 (!%p855_p4), 8, %v1241_v14  ;;  %v287_v18 = vshra.s32 (!%p855_p4), %v286_v15, 4  ;;  %v1244_v19 = vand.u32 (!%p855_p4), 15, %v286_v15  ;;  %v282_v20 = vadd.s32 (!%p855_p4), 16, %v1241_v14  ;;  %v180_v34 = vld [vmem:[%s1444_s0] sm:$0xff] (!%p855_p4)  ;;  %v530_v15 = vld [vmem:[%s1445_s1 + $0x90] sm:$0xff] (!%p855_p4) }
  0x15   : > { %1017 = vmatprep.subr.bf16.mxu1 (!%p855_p4), %v1016_v11  ;;  %v283_v21 = vadd.s32 (!%p855_p4), 24, %v1241_v14  ;;  %v385_v22 = vand.u32 (!%p855_p4), 15, %v1241_v14  ;;  %v374_v23 = vadd.s32 (!%p855_p4), 40, %v1241_v14  ;;  %v284_v28 = vadd.s32 (!%p855_p4), 32, %v1241_v14  ;;  %v527_v10 = vld [vmem:[%s1445_s1 + $0x60] sm:$0xff] (!%p855_p4)  ;;  %v528_v11 = vld [vmem:[%s1445_s1 + $0x70] sm:$0xff] (!%p855_p4) }
  0x16   : > { %v288_v25 = vadd.s32 (!%p855_p4), 32, %v287_v18  ;;  %v386_v26 = vand.u32 (!%p855_p4), 15, %v281_v17  ;;  %v387_v27 = vand.u32 (!%p855_p4), 15, %v282_v20  ;;  %v375_v38 = vadd.s32 (!%p855_p4), 48, %v1241_v14  ;;  %v529_v13 = vld [vmem:[%s1445_s1 + $0x80] sm:$0xff] (!%p855_p4) }
  0x17   : > { %v388_v29 = vand.u32 15, %v283_v21  ;;  %vm1258_vm3 = vcmp.eq.s32.totalorder %v385_v22, %v1244_v19  ;;  %v389_v32 = vand.u32 15, %v284_v28  ;;  %v390_v33 = vand.u32 15, %v374_v23 }
  0x18   : > { %1019 = vmatpush1.bf16.msra.mxu1 %v1018_v16  ;;  %vm289_vm1 = vcmp.eq.s32.totalorder %v1241_v14, %v288_v25  ;;  %vm290_vm2 = vcmp.eq.s32.totalorder %v281_v17, %v288_v25  ;;  %vm403_vm5 = vcmp.eq.s32.totalorder %v386_v26, %v1244_v19  ;;  %vm1274_vm7 = vcmp.eq.s32.totalorder %v387_v27, %v1244_v19 }
  0x19   : > { %216 = vmatprep.subr.mxu1 %v190_v24  ;;  %vm1269_vm6 = vmpackc.low %vm290_vm2, %vm289_vm1  ;;  %vm1279_vm8 = vcmp.eq.s32.totalorder %v388_v29, %v1244_v19  ;;  %v376_v39 = vadd.s32 56, %v1241_v14  ;;  %vm291_vm10 = vcmp.eq.s32.totalorder %v282_v20, %v288_v25  ;;  %vm292_vm11 = vcmp.eq.s32.totalorder %v283_v21, %v288_v25 }
  0x1a   : > { %vm1027_vm9 = vmpackc.low %vm403_vm5, %vm1258_vm3  ;;  %vm1295_vm13 = vcmp.eq.s32.totalorder %v389_v32, %v1244_v19  ;;  %vm1300_vm14 = vcmp.eq.s32.totalorder %v390_v33, %v1244_v19  ;;  %v391_v43 = vand.u32 15, %v375_v38  ;;  %v377_v45 = vadd.s32 64, %v1241_v14 }
  0x1b   : > { %1028 = vmatpush3.bf16.msk.msra.mxu0 %vm1027_vm9, %v1171_v40  ;;  %vm1030_vm12 = vmpackc.low %vm1279_vm8, %vm1274_vm7  ;;  %v392_v44 = vand.u32 15, %v376_v39  ;;  %v378_v46 = vadd.s32 72, %v1241_v14  ;;  %vm293_vm5 = vcmp.eq.s32.totalorder %v284_v28, %v288_v25  ;;  %v379_v51 = vadd.s32 80, %v1241_v14 }
  0x1c   : > { %217 = vmatpush1.msra.mxu1 %v189_v31  ;;  %vm1024_vm15 = vmpackc.low %vm292_vm11, %vm291_vm10  ;;  %1029 = vmatprep.subr.bf16.mxu0 %v1169_v9  ;;  %vm1323_vm2 = vcmp.eq.s32.totalorder %v391_v43, %v1244_v19  ;;  %v393_v48 = vand.u32 15, %v377_v45  ;;  %v380_v52 = vadd.s32 88, %v1241_v14  ;;  %v381_v55 = vadd.s32 96, %v1241_v14 }
  0x1d   : > { %857 = vmatmul.mubr.msk.f32.vlgmr.msra.gmra.mrb[0].mxu1 %vm204_vm4, %v180_v34  ;;  %1020 = vmatprep.subr.bf16.mxu1 %v1169_v9  ;;  %vm1033_vm1 = vmpackc.low %vm1300_vm14, %vm1295_vm13  ;;  %vm409_vm3 = vcmp.eq.s32.totalorder %v392_v44, %v1244_v19  ;;  %v394_v49 = vand.u32 15, %v378_v46  ;;  %v395_v53 = vand.u32 15, %v379_v51  ;;  %v382_v56 = vadd.s32 104, %v1241_v14 }
  0x1e   : > { %1022 = vmatpush3.bf16.msk.msra.mxu1 %vm1269_vm6, %v1171_v40  ;;  %952 = vmatprep.mubr.msk.f32.mxu1 %vm1170_vm0, %v1168_v8  ;;  %vm1036_vm6 = vmpackc.low %vm409_vm3, %vm1323_vm2  ;;  %vm410_vm7 = vcmp.eq.s32.totalorder %v393_v48, %v1244_v19  ;;  %v396_v54 = vand.u32 15, %v380_v52  ;;  %v397_v57 = vand.u32 15, %v381_v55  ;;  %v383_v59 = vadd.s32 112, %v1241_v14 }
  0x1f   : > { %1023 = vmatprep.subr.bf16.mxu1 %v1169_v9  ;;  %1031 = vmatpush3.bf16.msk.msra.mxu0 %vm1030_vm12, %v1171_v40  ;;  %vm411_vm8 = vcmp.eq.s32.totalorder %v394_v49, %v1244_v19  ;;  %v398_v58 = vand.u32 15, %v382_v56  ;;  %v384_v60 = vadd.s32 120, %v1241_v14  ;;  %v196_v0 = vsub.s32 0, %v1241_v14 }
  0x20   : > { %1032 = vmatprep.subr.bf16.mxu0 %v1169_v9  ;;  %vm1039_vm9 = vmpackc.low %vm411_vm8, %vm410_vm7  ;;  %vm413_vm10 = vcmp.eq.s32.totalorder %v396_v54, %v1244_v19  ;;  %vm414_vm11 = vcmp.eq.s32.totalorder %v397_v57, %v1244_v19  ;;  %v399_v61 = vand.u32 15, %v383_v59  ;;  %v1051_v12 = vpack.c.bf16 %v528_v11, %v527_v10 }
  0x21   : > { %vm415_vm12 = vcmp.eq.s32.totalorder %v398_v58, %v1244_v19  ;;  %v400_v62 = vand.u32 15, %v384_v60  ;;  %v197_v3 = vrot.slane %v856_v2, %v196_v0  ;;  %v1054_v16 = vpack.c.bf16 %v530_v15, %v529_v13 }
  0x22   : > { %1025 = vmatpush3.bf16.msk.msra.mxu1 %vm1024_vm15, %v1171_v40  ;;  %vm1045_vm13 = vmpackc.low %vm415_vm12, %vm414_vm11  ;;  %vm416_vm14 = vcmp.eq.s32.totalorder %v399_v61, %v1244_v19  ;;  %vm177_vm2 = vcmask 253952   ;;  %v200_v17 = vsub.s32 1, %v1241_v14  ;;  %vm531_vm3 = vcmask 261120  }
  0x23   : > { %950 = vmatprep.subr.mxu1 %v1168_v8  ;;  %1034 = vmatpush3.bf16.msk.msra.mxu0 %vm1033_vm1, %v1171_v40  ;;  %vm417_vm15 = vcmp.eq.s32.totalorder %v400_v62, %v1244_v19  ;;  %178 = vst.msk [vmem:[#allocation3] sm:$0x1] %vm177_vm2, %v1168_v8  ;;  %179 = vst.msk [vmem:[#allocation4] sm:$0x1] %vm177_vm2, %v1168_v8 }
  0x24   : > { %1035 = vmatprep.subr.bf16.mxu0 %v1169_v9  ;;  %vm1048_vm1 = vmpackc.low %vm417_vm15, %vm416_vm14 }
  0x26   : > { %951 = vmatpush3.msk.msra.mxu1 %vm293_vm5, %v1172_v50 }
  0x27   : > { %953 = vmatmul.mubr.msk.f32.vlgmr.msra.gmra.mrb[2].mxu1 %vm204_vm4, %v180_v34  ;;  %1050 = vmatprep.subr.bf16.mxu1 %v1169_v9  ;;  %vm412_vm4 = vcmp.eq.s32.totalorder %v395_v53, %v1244_v19 }
  0x28   : > { %1037 = vmatpush3.bf16.msk.msra.mxu0 %vm1036_vm6, %v1171_v40  ;;  %998 = vmatprep.mubr.msk.f32.mxu1 %vm1170_vm0, %v1168_v8  ;;  %vm1042_vm0 = vmpackc.low %vm413_vm10, %vm412_vm4 }
  0x29   : > { %1038 = vmatprep.subr.bf16.mxu0 %v1169_v9  ;;  %1052 = vmatpush3.bf16.msra.mxu1 %v1051_v12 }
  0x2a   : > { %1053 = vmatprep.subr.bf16.mxu1 %v1169_v9  ;;  %v609_v39 = vld [vmem:[#allocation3] sm:$0x1]  ;;  %v620_v42 = vld [vmem:[#allocation4] sm:$0x1] }
  0x2c   : > { %1040 = vmatpush3.bf16.msk.msra.mxu0 %vm1039_vm9, %v1171_v40 }
  0x2d   : > { %1041 = vmatprep.subr.bf16.mxu0 %v1169_v9  ;;  %1055 = vmatpush3.bf16.msra.mxu1 %v1054_v16 }
  0x30   : > { %1043 = vmatpush3.bf16.msk.msra.mxu0 %vm1042_vm0, %v1171_v40 }
  0x31   : > { %1044 = vmatprep.subr.bf16.mxu0 %v1169_v9 }
  0x34   : > { %1046 = vmatpush3.bf16.msk.msra.mxu0 %vm1045_vm13, %v1171_v40 }
  0x35   : > { %1047 = vmatprep.subr.bf16.mxu0 %v1169_v9  ;;  %v201_v9 = vrot.slane %v856_v2, %v200_v17 }
  0x38   : > { %1049 = vmatpush3.bf16.msk.msra.mxu0 %vm1048_vm1, %v1171_v40 }
  0xf0   : > { %v274_v63 = vpop.f32.mrb[0].mxu1 }
  0xf1   : > { %v276_v1 = vpop.f32.mrb[1].mxu1  ;;  %v275_v4 = vadd.f32 %v274_v63, %v197_v3 }
  0xf2   : > { %v277_v18 = vadd.f32 %v276_v1, %v201_v9 }
  0xfa   : > { %v370_v5 = vpop.f32.mrb[2].mxu1 }
  0xfb   : > { %v450_v6 = vmul.f32 %v370_v5, %v275_v4  ;;  %v954_v7 = vpop.f32.mrb[3].mxu1 }
  0xfd   : > { %988 = vmatmul.mubr.f32.vlgmr.msra.gmra.mrb[0].mxu0 %v450_v6 }
 0x1d0   : > { %v517_v19 = vpop.f32.mrb[0].mxu0 }
 0x1d1   : > { %v518_v20 = vadd.f32 %v517_v19, %v277_v18  ;;  %v989_v21 = vpop.f32.mrb[1].mxu0 }
 0x1d3   : > { %v522_v22 = vmin.f32 %v518_v20, 0.0  ;;  %vm521_vm5 = vcmp.gt.f32.partialorder %v518_v20, 0.0 }
 0x1d5   : > { %v523_v23 = vmul.f32 1.442695, %v522_v22 }
 0x1d7   : > { %1106 = vpow2.f32 %v523_v23 }
 0x1e1   : > { %v1107_v24 = vpop.eup %1106 }
 0x1e2   : > { %v901_v25 = vadd.f32 -1.0, %v1107_v24 }
 0x1e4   : > { %v526_v26 = vsel %vm521_vm5, %v518_v20, %v901_v25 }
 0x1e5   : > { %999 = vmatmul.mubr.msk.f32.vlgmr.msra.gmra.mrb[4].mxu1 %vm531_vm3, %v526_v26 }
 0x2b8   : > { %v601_v27 = vpop.f32.mrb[4].mxu1 }
 0x2b9   : > { %v610_v28 = vsel %vm531_vm3, %v601_v27, 0.0  ;;  %v621_v29 = vmul.f32 %v601_v27, %v601_v27  ;;  %632 = vst.msk [vmem:[#allocation2] sm:$0xff] %vm531_vm3, %v601_v27  ;;  %v1000_v8 = vpop.f32.mrb[5].mxu1 }
 0x2ba   : > { %v611_v14 = vrot.slane %v610_v28, 4 }
 0x2bb   : > { %v622_v30 = vsel %vm531_vm3, %v621_v29, 0.0 }
 0x2bc   : > { %v612_v31 = vadd.f32 %v611_v14, %v610_v28  ;;  %v623_v32 = vrot.slane %v622_v30, 4 }
 0x2be   : > { %v613_v33 = vrot.slane %v612_v31, 2  ;;  %v624_v34 = vadd.f32 %v623_v32, %v622_v30 }
 0x2c0   : > { %v614_v35 = vadd.f32 %v613_v33, %v612_v31  ;;  %v625_v36 = vrot.slane %v624_v34, 2 }
 0x2c2   : > { %v615_v37 = vrot.slane %v614_v35, 1  ;;  %v626_v38 = vadd.f32 %v625_v36, %v624_v34 }
 0x2c4   : > { %v616_v40 = vadd.f32 %v615_v37, %v614_v35  ;;  %v627_v41 = vrot.slane %v626_v38, 1 }
 0x2c6   : > { %v617_v43 = vadd.f32 %v616_v40, %v609_v39  ;;  %v628_v44 = vadd.f32 %v627_v41, %v626_v38 }
 0x2c8   : > { %619 = vst.msk [vmem:[#allocation3] sm:$0x1] %vm177_vm2, %v617_v43  ;;  %v629_v45 = vadd.f32 %v628_v44, %v620_v42 }
 0x2ca   : > { %630 = vst.msk [vmem:[#allocation4] sm:$0x1] %vm177_vm2, %v629_v45 }
 0x2cb PF: > { %p903_p5 = scmp.ne.s32.totalorder %s1158_s9, 1 }
 0x2cc   : > { %v637_v46 = vld [vmem:[%s1445_s1 + $0xa0] sm:$0xff] (!%p903_p5)  ;;  %v638_v47 = vld [vmem:[%s1445_s1 + $0xb0] sm:$0xff] (!%p903_p5)  ;;  %v1173_v49 = vmov (!%p903_p5), 0.0|0.0   ;;  %vm1174_vm6 = vmmov (!%p903_p5), 0   ;;  %v1175_v52 = vmov (!%p903_p5), 0.0   ;;  %v654_v59 = vlaneseq (!%p903_p5) }
 0x2cd   : > { %636 = sbr.rel (%p903_p5) target bundleno = 998 (0x3e6), region = 40  ;;  %v639_v48 = vld [vmem:[%s1445_s1 + $0xc0] sm:$0xff] (!%p903_p5)  ;;  %1056 = vmatprep.subr.bf16.mxu0 (!%p903_p5), %v1173_v49  ;;  %v1057_v50 = vpack.c.bf16 (!%p903_p5), %v638_v47, %v637_v46  ;;  %v640_v51 = vld [vmem:[%s1445_s1 + $0xd0] sm:$0xff] (!%p903_p5)  ;;  %1009 = vmatprep.mubr.msk.f32.mxu0 (!%p903_p5), %vm1174_vm6, %v1175_v52  ;;  %vm674_vm8 = vcmask (!%p903_p5), 261120  }
 0x2ce   : > { %v1060_v55 = vpack.c.bf16 (!%p903_p5), %v640_v51, %v639_v48  ;;  %v655_v62 = vshrl.u32 (!%p903_p5), %v654_v59, 7  ;;  %v645_v2 = vld [vmem:[#allocation2] sm:$0xff] (!%p903_p5)  ;;  %v749_v22 = vand.u32 (!%p903_p5), 127, %v654_v59 }
 0x2cf   : > { %v646_v53 = vld [vmem:[#allocation3] sm:$0x1] (!%p903_p5)  ;;  %1058 = vmatpush3.bf16.msra.mxu0 (!%p903_p5), %v1057_v50  ;;  %v641_v6 = vld [vmem:[%s1445_s1 + $0xe0] ss:$0 sm:$0xff] (!%p903_p5)  ;;  %v642_v10 = vld [vmem:[%s1445_s1 + $0xe1] ss:$0 sm:$0xff] (!%p903_p5) }
 0x2d0   : > { %v647_v56 = vmul.f32 (!%p903_p5), 0.125, %v646_v53  ;;  %1059 = vmatprep.subr.bf16.mxu0 (!%p903_p5), %v1173_v49  ;;  %v656_v0 = vsub.s32 (!%p903_p5), 0, %v655_v62  ;;  %v643_v16 = vld [vmem:[%s1445_s1 + $0xe2] ss:$0 sm:$0xff] (!%p903_p5)  ;;  %vm760_vm4 = vcmp.ge.s32.totalorder (!%p903_p5), %v749_v22, 16 }
 0x2d1   : > { %v648_v54 = vld [vmem:[#allocation4] sm:$0x1] (!%p903_p5) }
 0x2d2   : > { %v649_v57 = vmul.f32 (!%p903_p5), 0.125, %v648_v54  ;;  %v650_v58 = vmul.f32 (!%p903_p5), %v647_v56, %v647_v56  ;;  %v657_v1 = vrot.slane (!%p903_p5), %v647_v56, %v656_v0 }
 0x2d3   : > { %1061 = vmatpush3.bf16.msra.mxu0 (!%p903_p5), %v1060_v55 }
 0x2d4   : > { %v651_v60 = vsub.f32 %v649_v57, %v650_v58  ;;  %v659_v3 = vsub.f32 %v645_v2, %v657_v1 }
 0x2d6   : > { %v652_v61 = vmax.f32 %v651_v60, 0.0 }
 0x2d8   : > { %v660_v63 = vadd.f32 1e-05, %v652_v61 }
 0x2da   : > { %1108 = vrsqrt.f32 %v660_v63 }
 0x2e4   : > { %v1109_v4 = vpop.eup %1108 }
 0x2e5   : > { %v666_v5 = vrot.slane %v1109_v4, %v656_v0 }
 0x2e7   : > { %v668_v7 = vmul.f32 %v666_v5, %v659_v3 }
 0x2e9   : > { %v669_v11 = vmul.f32 %v668_v7, %v641_v6 }
 0x2eb   : > { %v670_v12 = vadd.f32 %v669_v11, %v642_v10 }
 0x2ed   : > { %vm671_vm7 = vcmp.gt.f32.partialorder %v670_v12, 0.0  ;;  %v672_v13 = vmul.f32 0.01, %v670_v12 }
 0x2ef   : > { %v673_v15 = vsel %vm671_vm7, %v670_v12, %v672_v13 }
 0x2f0   : > { %1010 = vmatmul.mubr.msk.f32.vlgmr.msra.gmra.mrb[0].mxu0 %vm674_vm8, %v673_v15 }
 0x3c3   : > { %v744_v17 = vpop.f32.mrb[0].mxu0 }
 0x3c4   : > { %v745_v9 = vadd.f32 %v744_v17, %v643_v16  ;;  %v1011_v18 = vpop.f32.mrb[1].mxu0 }
 0x3c6   : > { %v750_v19 = vmul.f32 1.442695, %v745_v9 }
 0x3c8   : > { %1110 = vpow2.f32 %v750_v19 }
 0x3d2   : > { %v1111_v20 = vpop.eup %1110 }
 0x3d3   : > { %v752_v21 = vmax.f32 %v1111_v20, 0.002 }
 0x3d5   : > { %1112 = vrsqrt.f32 %v752_v21  ;;  %vm755_vm9 = vcmp.eq.f32.partialorder %v752_v21, inf  ;;  %v758_v25 = vand.u32 2147483648, %v752_v21  ;;  %vm757_vm10 = vcmp.eq.f32.partialorder %v752_v21, 0.0 }
 0x3df   : > { %v1113_v23 = vpop.eup %1112 }
 0x3e0   : > { %v754_v24 = vmul.f32 %v1113_v23, %v752_v21 }
 0x3e2   : > { %v756_v26 = vsel %vm755_vm9, %v752_v21, %v754_v24 }
 0x3e3   : > { %v759_v27 = vsel %vm757_vm10, %v758_v25, %v756_v26 }
 0x3e4   : > { %v761_v28 = vsel %vm760_vm4, %v759_v27, %v745_v9 }
 0x3e5   : > { %762 = vst.msk [vmem:[#allocation5] sm:$0xff] %vm674_vm8, %v761_v28 }
 0x3e6 PF: > { %p1410_p6 = scmp.eq.s32.totalorder %s849_s12, 1  ;;  %s1176_s17 = smov [#allocation5]  }
 0x3e7   : > { %s778_s18 = sshll.u32 %s1176_s17, 4  ;;  %s779_s18 = int_to_ptr.vmem [resolvable:$true] %s778_s18 }
 0x3e8   : > { %s1114_s19 = scalar_lea.vmem %s779_s18, 128  ;;  %s1120_s20 = scalar_lea.vmem %s779_s18, 256 }
 0x3e9   : > { %p1115_p7 = scmp.ne.s32.totalorder %s779_s18, %s1114_s19  ;;  %p1121_p10 = scmp.lt.s32.totalorder %s779_s18, %s779_s18 }
 0x3ea   : > { %p1122_p11 = scmp.lt.s32.totalorder %s1120_s20, %s1114_s19 }
 0x3eb   : > { %p1116_p8 = pnand %p1115_p7, %p1410_p6 }
 0x3ec   : > { %p1123_p12 = por %p1122_p11, %p1121_p10 }
 0x3ed   : > { %p1117_p9 = pneg %p1116_p8 }
 0x3ef   : > { %p1124_p13 = pnand %p1123_p12, %p1117_p9 }
 0x3f1   : > { %1127 = shalt.err (!%p1124_p13)
}
 0x3f2   : > { %s1128_s22 = scalar_lea.hbm %s1446_s2, 128 }
 0x3f3   : > { %p1129_p0 = scmp.ne.s32.totalorder %s1446_s2, %s1128_s22  ;;  %p1134_p3 = scmp.lt.u32.totalorder %s1128_s22, %s1446_s2 }
 0x3f5   : > { %p1130_p1 = pnand %p1129_p0, %p1410_p6 }
 0x3f7   : > { %p1131_p2 = pneg %p1130_p1 }
 0x3f9   : > { %p1136_p4 = pnand %p1134_p3, %p1131_p2 }
 0x3fb   : > { %1139 = shalt.err (!%p1136_p4)
}
 0x3fc   : > { %1063 = dma.vmem_to_hbm [thread:$0]  (%p1410_p6), %s779_s18, 128, %s1446_s2, [#allocation6]  }
 0x3fd PF: > { %p1071_p5 = scmp.ge.s32.totalorder %s1166_s11, 2  ;;  %p1072_p7 = scmp.eq.s32.totalorder %s850_s13, 1 }
 0x3ff   : > { %p1067_p8 = pnand %p1072_p7, %p1071_p5 }
 0x401   : > { %1153 = dma.done.wait (!%p1067_p8), [#allocation6], 128  }
 0x402   : > { %1155 = vsyncadd (!%p1067_p8), [#allocation6], 4294967168  ;;  %s15_s11 = sadd.s32 1, %s1166_s11   ;;  %s1462_s9 = smov %s1162_s10 }
 0x403   : > { %p12_p9 = scmp.ge.s32.totalorder %s15_s11, 4   ;;  %s1463_s10 = smov %s1465_s14 }
 0x405   :  { %14 = sbr.rel (!%p12_p9) target bundleno = 3 (0x3), region = 78 }
 0x40c   :  { %796 = vsyncpa [#allocation6], 1 }
 0x40d   :  { %798 = vsyncpa [#allocation6 + $0x1], 1 }

</bundles_post_ra>
